<compile_context>
chip_gen: v7x
topology: tpu7x:2x2x1
jax: 0.10.0
libtpu: 0.0.40
codegen_flags: <defaults>
</compile_context>

<pallas_src>
import functools

import jax
import jax.numpy as jnp
from jax.experimental import pallas as pl
from jax.experimental.pallas import tpu as pltpu

LANE = 128              # TPU lane width (last dim)
SUBLANE = 8             # TPU sublane width (second-to-last dim)
GRIDLESS_MAX_BATCH = 1024   # below this, a single full-array kernel call
TILE_B = 512            # batch tile for the gridded (pipelined) path


def _pad_axis(a: jax.Array, axis: int, multiple: int) -> jax.Array:
    """Zero-pad `axis` of `a` up to the next multiple of `multiple`."""
    size = a.shape[axis]
    pad = (-size) % multiple
    if pad == 0:
        return a
    widths = [(0, 0)] * a.ndim
    widths[axis] = (0, pad)
    return jnp.pad(a, widths)


# ----------------------------------------------------------------------------
# Fused MLP kernel body (shared by the grid-less and gridded paths).
# refs = (x, w0, b0, w1, b1, ..., w_{L-1}, b_{L-1}, out)
#   x: (B_tile, D_in)      bf16
#   w: (Din_pad, Dout_pad) bf16   b: (1, Dout_pad) f32
# ----------------------------------------------------------------------------
def _fused_mlp_kernel(*refs, n_layers: int, n_hidden: int):
    x_ref = refs[0]
    o_ref = refs[-1]
    param_refs = refs[1:-1]

    x = x_ref[...]                         # bf16 into the MXU
    y = x
    for i in range(n_layers):
        w = param_refs[2 * i][...]         # bf16 (Din_pad, Dout_pad)
        b = param_refs[2 * i + 1][...]     # f32  (1, Dout_pad), row-broadcast
        y = jnp.dot(x, w, preferred_element_type=jnp.float32) + b
        if i < n_hidden:                   # hidden miniblocks get ReLU
            y = jnp.maximum(y, 0.0)
        x = y.astype(w.dtype)              # back to bf16 for the next MXU push
    o_ref[...] = y.astype(o_ref.dtype)     # final layer result (f32 epilogue)


def fused_mlp_pallas(x: jax.Array, padded_params, n_hidden: int,
                     out_dtype=jnp.float32) -> jax.Array:
    """One pallas_call for the whole MLP. x: (B, D_in) bf16 (unpadded dims ok)."""
    assert len(padded_params) >= 1, (
        "MLP with zero layers (hidden_sizes=() and output_dim=0) is not supported")
    flat_params = []
    for w, b in padded_params:
        flat_params += [w, b]
    n_layers = len(padded_params)
    out_pad = padded_params[-1][0].shape[1]
    B, d_in = x.shape

    kernel = functools.partial(
        _fused_mlp_kernel, n_layers=n_layers, n_hidden=n_hidden)

    if B <= GRIDLESS_MAX_BATCH:
        # Grid-less call: everything fits in VMEM with huge margin; full-array
        # blocks (exempt from the (8,128) rule) and no software pipeline.
        return pl.pallas_call(
            kernel,
            out_shape=jax.ShapeDtypeStruct((B, out_pad), out_dtype),
            in_specs=[pl.BlockSpec(memory_space=pltpu.MemorySpace.VMEM)]
            * (1 + len(flat_params)),
            out_specs=pl.BlockSpec(memory_space=pltpu.MemorySpace.VMEM),
        )(x, *flat_params)

    # Gridded path: pipeline the activations over batch tiles; weights/biases
    # keep a constant index_map so they stay VMEM-resident (no re-DMA).
    x = _pad_axis(x, 0, TILE_B)            # zero rows are harmless, sliced off
    b_pad = x.shape[0]
    n_tiles = b_pad // TILE_B

    in_specs = [pl.BlockSpec((TILE_B, d_in), lambda i: (i, 0))]
    for p in flat_params:
        in_specs.append(pl.BlockSpec(p.shape, lambda i: (0, 0)))
    out_specs = pl.BlockSpec((TILE_B, out_pad), lambda i: (i, 0))

    return pl.pallas_call(
        kernel,
        out_shape=jax.ShapeDtypeStruct((b_pad, out_pad), out_dtype),
        grid=(n_tiles,),
        in_specs=in_specs,
        out_specs=out_specs,
        compiler_params=pltpu.CompilerParams(
            dimension_semantics=("parallel",)),
    )(x, *flat_params)


# ----------------------------------------------------------------------------
# Parameter init (torch.nn.Linear default: U(-1/sqrt(fan_in), 1/sqrt(fan_in)))
# + lane padding / bf16 cast of the parameters (done once, off the hot path).
# Weights stored as (in_dim, out_dim) so y = x @ W + b == PyTorch x @ W_pt.T + b.
# ----------------------------------------------------------------------------
def init_mlp_params(key, input_dim, hidden_sizes, output_dim):
    dims = [input_dim] + list(hidden_sizes)
    if output_dim > 0:
        dims = dims + [output_dim]
    params = []
    for in_d, out_d in zip(dims[:-1], dims[1:]):
        key, kw, kb = jax.random.split(key, 3)
        bound = 1.0 / (in_d ** 0.5)
        w = jax.random.uniform(kw, (in_d, out_d), jnp.float32, -bound, bound)
        b = jax.random.uniform(kb, (out_d,), jnp.float32, -bound, bound)
        params.append((w, b))
    return params


def pad_params(params):
    """Lane-pad (out_dim -> mult of 128) and cast weights to bf16.

    The first layer's in_dim is left unpadded (the kernel input is not
    feature-padded); subsequent in_dims are padded to match the previous
    layer's padded out_dim.  Biases stay f32 (f32 epilogue).
    """
    padded = []
    for i, (w, b) in enumerate(params):
        w_p = w
        if i > 0:
            w_p = _pad_axis(w_p, 0, LANE)
        w_p = _pad_axis(w_p, 1, LANE).astype(jnp.bfloat16)
        b_p = _pad_axis(b.reshape(1, -1), 1, LANE).astype(jnp.float32)
        padded.append((w_p, b_p))
    return padded


# ----------------------------------------------------------------------------
# Net forward (no dueling, num_atoms=1): obs -> flatten -> MLP -> logits
# ----------------------------------------------------------------------------
def net_forward(padded_params, obs, *, output_dim, softmax=False,
                flatten_input=True):
    x = obs.astype(jnp.float32)
    if flatten_input:
        x = x.reshape(x.shape[0], -1)
    batch = x.shape[0]
    n_layers = len(padded_params)
    n_hidden = n_layers - 1 if output_dim > 0 else n_layers

    x = x.astype(jnp.bfloat16)             # bf16 operands for the MXU
    y = fused_mlp_pallas(x, padded_params, n_hidden)
    logits = y[:batch, :output_dim]
    if softmax:  # Net(softmax=True) option; trivial, kept at the JAX boundary
        logits = jax.nn.softmax(logits, axis=-1)
    return logits


# Pure-JAX reference mirroring the kernel arithmetic (bf16 matmul operands,
# f32 accumulation/epilogue) on the UNPADDED params, for correctness checks.
def net_forward_ref(params, obs, *, output_dim, softmax=False,
                    flatten_input=True):
    x = obs.astype(jnp.float32)
    if flatten_input:
        x = x.reshape(x.shape[0], -1)
    n_layers = len(params)
    n_hidden = n_layers - 1 if output_dim > 0 else n_layers
    x = x.astype(jnp.bfloat16)
    y = x
    for i, (w, b) in enumerate(params):
        y = jnp.dot(x, w.astype(jnp.bfloat16),
                    preferred_element_type=jnp.float32) + b
        if i < n_hidden:
            y = jnp.maximum(y, 0.0)
        x = y.astype(jnp.bfloat16)
    out = y
    if softmax:
        out = jax.nn.softmax(out, axis=-1)
    return out


if __name__ == "__main__":
    key = jax.random.PRNGKey(0)
    k_obs, k_obs_big, k_params = jax.random.split(key, 3)

    # Net(state_shape=(4, 16), action_shape=8, hidden_sizes=(32, 32)):
    # obs (batch, 4, 16) -> flatten (batch, 64) -> MLP 64 -> 32 -> 32 -> 8.
    input_dim = 4 * 16
    hidden_sizes = (32, 32)
    output_dim = 8

    params = init_mlp_params(k_params, input_dim, hidden_sizes, output_dim)
    padded_params = pad_params(params)

    fwd = jax.jit(functools.partial(net_forward, output_dim=output_dim))

    # --- small batch: grid-less path ----------------------------------------
    batch = 2
    obs = jax.random.normal(k_obs, (batch, 4, 16), dtype=jnp.float32)
    out = jax.block_until_ready(fwd(padded_params, obs))
    ref = net_forward_ref(params, obs, output_dim=output_dim)
    assert out.shape == (batch, output_dim), out.shape
    assert jnp.allclose(out, ref, atol=2e-3, rtol=2e-3), "small-batch mismatch"

    # --- large batch: gridded (pipelined, batch-parallel) path ---------------
    big_batch = 2048
    obs_big = jax.random.normal(k_obs_big, (big_batch, 4, 16), dtype=jnp.float32)
    out_big = jax.block_until_ready(fwd(padded_params, obs_big))
    ref_big = net_forward_ref(params, obs_big, output_dim=output_dim)
    assert out_big.shape == (big_batch, output_dim), out_big.shape
    assert jnp.allclose(out_big, ref_big, atol=2e-3, rtol=2e-3), "large-batch mismatch"

    print("KERNEL_OK")
</pallas_src>

<mosaic_0001>
module attributes {stable_mosaic.version = 11 : i64} {
  func.func @_fused_mlp_kernel(%arg0: memref<2x64xbf16, #tpu.memory_space<vmem>>, %arg1: memref<64x128xbf16, #tpu.memory_space<vmem>>, %arg2: memref<1x128xf32, #tpu.memory_space<vmem>>, %arg3: memref<128x128xbf16, #tpu.memory_space<vmem>>, %arg4: memref<1x128xf32, #tpu.memory_space<vmem>>, %arg5: memref<128x128xbf16, #tpu.memory_space<vmem>>, %arg6: memref<1x128xf32, #tpu.memory_space<vmem>>, %arg7: memref<2x128xf32, #tpu.memory_space<vmem>>) attributes {dimension_semantics = [], scalar_prefetch = 0 : i64, scratch_operands = 0 : i64, tpu.core_type = #tpu.core_type<tc>} {
    %c0 = arith.constant 0 : index
    %c0_0 = arith.constant 0 : index
    %0 = vector.load %arg0[%c0, %c0_0] : memref<2x64xbf16, #tpu.memory_space<vmem>>, vector<2x64xbf16>
    %c0_1 = arith.constant 0 : index
    %c0_2 = arith.constant 0 : index
    %1 = vector.load %arg1[%c0_1, %c0_2] : memref<64x128xbf16, #tpu.memory_space<vmem>>, vector<64x128xbf16>
    %c0_3 = arith.constant 0 : index
    %c0_4 = arith.constant 0 : index
    %2 = vector.load %arg2[%c0_3, %c0_4] : memref<1x128xf32, #tpu.memory_space<vmem>>, vector<1x128xf32>
    %cst = arith.constant dense<0.000000e+00> : vector<2x128xf32>
    %3 = tpu.matmul %0, %1, %cst {dimension_numbers = #tpu.dot_dimension_numbers<[1], [0], [0], [1], [0, 0, 1, 1], [], []>} : vector<2x64xbf16>, vector<64x128xbf16>, vector<2x128xf32> -> vector<2x128xf32>
    %4 = vector.broadcast %2 : vector<1x128xf32> to vector<2x128xf32>
    %5 = arith.addf %3, %4 : vector<2x128xf32>
    %cst_5 = arith.constant 0.000000e+00 : f32
    %6 = vector.broadcast %cst_5 : f32 to vector<2x128xf32>
    %7 = arith.maximumf %5, %6 : vector<2x128xf32>
    %8 = arith.truncf %7 : vector<2x128xf32> to vector<2x128xbf16>
    %c0_6 = arith.constant 0 : index
    %c0_7 = arith.constant 0 : index
    %9 = vector.load %arg3[%c0_6, %c0_7] : memref<128x128xbf16, #tpu.memory_space<vmem>>, vector<128x128xbf16>
    %c0_8 = arith.constant 0 : index
    %c0_9 = arith.constant 0 : index
    %10 = vector.load %arg4[%c0_8, %c0_9] : memref<1x128xf32, #tpu.memory_space<vmem>>, vector<1x128xf32>
    %cst_10 = arith.constant dense<0.000000e+00> : vector<2x128xf32>
    %11 = tpu.matmul %8, %9, %cst_10 {dimension_numbers = #tpu.dot_dimension_numbers<[1], [0], [0], [1], [0, 0, 1, 1], [], []>} : vector<2x128xbf16>, vector<128x128xbf16>, vector<2x128xf32> -> vector<2x128xf32>
    %12 = vector.broadcast %10 : vector<1x128xf32> to vector<2x128xf32>
    %13 = arith.addf %11, %12 : vector<2x128xf32>
    %cst_11 = arith.constant 0.000000e+00 : f32
    %14 = vector.broadcast %cst_11 : f32 to vector<2x128xf32>
    %15 = arith.maximumf %13, %14 : vector<2x128xf32>
    %16 = arith.truncf %15 : vector<2x128xf32> to vector<2x128xbf16>
    %c0_12 = arith.constant 0 : index
    %c0_13 = arith.constant 0 : index
    %17 = vector.load %arg5[%c0_12, %c0_13] : memref<128x128xbf16, #tpu.memory_space<vmem>>, vector<128x128xbf16>
    %c0_14 = arith.constant 0 : index
    %c0_15 = arith.constant 0 : index
    %18 = vector.load %arg6[%c0_14, %c0_15] : memref<1x128xf32, #tpu.memory_space<vmem>>, vector<1x128xf32>
    %cst_16 = arith.constant dense<0.000000e+00> : vector<2x128xf32>
    %19 = tpu.matmul %16, %17, %cst_16 {dimension_numbers = #tpu.dot_dimension_numbers<[1], [0], [0], [1], [0, 0, 1, 1], [], []>} : vector<2x128xbf16>, vector<128x128xbf16>, vector<2x128xf32> -> vector<2x128xf32>
    %20 = vector.broadcast %18 : vector<1x128xf32> to vector<2x128xf32>
    %21 = arith.addf %19, %20 : vector<2x128xf32>
    %c0_17 = arith.constant 0 : index
    %c0_18 = arith.constant 0 : index
    %22 = vector.load %arg7[%c0_17, %c0_18] : memref<2x128xf32, #tpu.memory_space<vmem>>, vector<2x128xf32>
    tpu.vector_store %arg7[%c0_17, %c0_18], %21 {strides = array<i32>} : memref<2x128xf32, #tpu.memory_space<vmem>>, vector<2x128xf32>,
    return
  }
}

</mosaic_0001>

<bundles_post_ra>
// kernel: net_forward.1
= control target key start
LH: loop header
LB: loop body
LE: loop exit
PB: predicated region body
PF: predicated region fallthrough
CT: control target
= control target key end

     0   :  { %12 = vsyncpa [#allocation3], 0  ;;  %s767_s0 = inlined_call_operand.vmem [shape: bf16[2,64], index: 0, kind: input, shape index: {}]   ;;  %s768_s1 = inlined_call_operand.hbm [shape: bf16[64,128], index: 1, kind: input, shape index: {}]   ;;  %s769_s2 = inlined_call_operand.vmem [shape: f32[1,128], index: 2, kind: input, shape index: {}]   ;;  %s770_s3 = inlined_call_operand.hbm [shape: bf16[128,128], index: 3, kind: input, shape index: {}]   ;;  %s771_s4 = inlined_call_operand.vmem [shape: f32[1,128], index: 4, kind: input, shape index: {}]   ;;  %s772_s5 = inlined_call_operand.hbm [shape: bf16[128,128], index: 5, kind: input, shape index: {}]   ;;  %s773_s6 = inlined_call_operand.vmem [shape: f32[1,128], index: 6, kind: input, shape index: {}]   ;;  %s774_s7 = inlined_call_operand.hbm [shape: f32[2,128], index: 7, kind: output, shape index: {}]  }
   0x1   :  { %13 = vsyncpa [#allocation6], 0 }
   0x2   :  { %14 = vsyncpa [#allocation4], 0  ;;  %s617_s24 = smov [#allocation5]   ;;  %s618_s26 = smov [#allocation2]  }
   0x3   :  { %s36_s25 = sshll.u32 %s617_s24, 4  ;;  %s22_s27 = sshll.u32 %s618_s26, 4  ;;  %s37_s25 = int_to_ptr.vmem [resolvable:$true] %s36_s25  ;;  %s665_s27 = int_to_ptr.vmem [resolvable:$true] %s22_s27 }
   0x4   :  { %s523_s30 = scalar_lea.hbm %s770_s3, 1024 }
   0x5   :  { %p524_p0 = scmp.ne.s32.totalorder %s770_s3, %s523_s30  ;;  %p527_p1 = scmp.lt.u32.totalorder %s523_s30, %s770_s3 }
   0x7   :  { %p529_p2 = pnand %p527_p1, %p524_p0 }
   0x9   :  { %532 = shalt.err (!%p529_p2)
}
   0xa   :  { %s533_s12 = scalar_lea.vmem %s37_s25, 1024  ;;  %p538_p4 = scmp.lt.s32.totalorder %s37_s25, %s37_s25 }
   0xb   :  { %p534_p3 = scmp.ne.s32.totalorder %s37_s25, %s533_s12  ;;  %p539_p5 = scmp.lt.s32.totalorder %s533_s12, %s533_s12 }
   0xd   :  { %p540_p6 = por %p539_p5, %p538_p4 }
   0xf   :  { %p541_p7 = pnand %p540_p6, %p534_p3 }
  0x11   :  { %544 = shalt.err (!%p541_p7)
}
  0x12   :  { %s619_s13 = smov 64   ;;  %s620_s14 = smov 4  }
  0x13   :  { %42 = dma.hbm_to_vmem [thread:$0]  %s770_s3, 1024, %s37_s25, [#allocation6], %s619_s13, %s619_s13, %s620_s14  }
  0x14   :  { %s545_s19 = scalar_lea.hbm %s768_s1, 512 }
  0x15   :  { %p546_p8 = scmp.ne.s32.totalorder %s768_s1, %s545_s19  ;;  %p549_p9 = scmp.lt.u32.totalorder %s545_s19, %s768_s1 }
  0x17   :  { %p551_p10 = pnand %p549_p9, %p546_p8 }
  0x19   :  { %554 = shalt.err (!%p551_p10)
}
  0x1a   :  { %s555_s24 = scalar_lea.vmem %s665_s27, 512  ;;  %p560_p12 = scmp.lt.s32.totalorder %s665_s27, %s665_s27 }
  0x1b   :  { %p556_p11 = scmp.ne.s32.totalorder %s665_s27, %s555_s24  ;;  %p561_p13 = scmp.lt.s32.totalorder %s555_s24, %s555_s24 }
  0x1d   :  { %p562_p0 = por %p561_p13, %p560_p12 }
  0x1f   :  { %p563_p1 = pnand %p562_p0, %p556_p11 }
  0x21   :  { %566 = shalt.err (!%p563_p1)
}
  0x22   :  { %28 = dma.hbm_to_vmem [thread:$0]  %s768_s1, 512, %s665_s27, [#allocation3], %s619_s13, %s619_s13, %s620_s14  }
  0x23   :  { %s621_s26 = smov [#allocation7]   ;;  %s567_s8 = scalar_lea.hbm %s772_s5, 1024 }
  0x24   :  { %s50_s28 = sshll.u32 %s621_s26, 4  ;;  %p568_p2 = scmp.ne.s32.totalorder %s772_s5, %s567_s8  ;;  %s51_s28 = int_to_ptr.vmem [resolvable:$true] %s50_s28 }
  0x25   :  { %p571_p3 = scmp.lt.u32.totalorder %s567_s8, %s772_s5 }
  0x27   :  { %p573_p4 = pnand %p571_p3, %p568_p2 }
  0x29   :  { %576 = shalt.err (!%p573_p4)
}
  0x2a   :  { %s577_s15 = scalar_lea.vmem %s51_s28, 1024  ;;  %p582_p6 = scmp.lt.s32.totalorder %s51_s28, %s51_s28 }
  0x2b   :  { %p578_p5 = scmp.ne.s32.totalorder %s51_s28, %s577_s15  ;;  %p583_p7 = scmp.lt.s32.totalorder %s577_s15, %s577_s15 }
  0x2d   :  { %p584_p8 = por %p583_p7, %p582_p6 }
  0x2f   :  { %p585_p9 = pnand %p584_p8, %p578_p5 }
  0x31   :  { %588 = shalt.err (!%p585_p9)
}
  0x32   :  { %56 = dma.hbm_to_vmem [thread:$0]  %s772_s5, 1024, %s51_s28, [#allocation6], %s619_s13, %s619_s13, %s620_s14  }
  0x33   :  { %611 = dma.done.wait [#allocation3], 512  }
  0x34   :  { %612 = vsyncadd [#allocation3], 4294966784 }
  0x35   :  { %613 = dma.done.wait [#allocation6], 2048  }
  0x36   :  { %614 = vsyncadd [#allocation6], 4294965248  ;;  %v622_v0 = vmov 0.0   ;;  %vm623_vm0 = vmmov 0   ;;  %v503_v1 = vld [vmem:[#allocation2] sm:$0xff]   ;;  %v504_v2 = vld [vmem:[#allocation2 + $0x8] sm:$0xff]  }
  0x37   :  { %443 = vmatprep.subr.bf16.mxu0 %v622_v0  ;;  %451 = vmatprep.mubr.msk.bf16.mxu0 %vm623_vm0, %v622_v0  ;;  %v507_v3 = vld [vmem:[#allocation5] sm:$0xff]   ;;  %v505_v4 = vld [vmem:[#allocation2 + $0x10] sm:$0xff]   ;;  %v508_v5 = vld [vmem:[#allocation5 + $0x8] sm:$0xff]   ;;  %vm109_vm1 = vcmask 523264   ;;  %s624_s19 = smov [#allocation8]  }
  0x38   :  { %455 = vmatprep.subr.bf16.mxu1 %v622_v0  ;;  %471 = vmatprep.mubr.msk.bf16.mxu1 %vm623_vm0, %v622_v0  ;;  %v506_v6 = vld [vmem:[#allocation2 + $0x18] sm:$0xff]   ;;  %v509_v7 = vld [vmem:[#allocation5 + $0x10] sm:$0xff]   ;;  %v69_v8 = vld [vmem:[%s767_s0] sm:$0x1]  ;;  %s386_s20 = sshll.u32 %s624_s19, 4  ;;  %s387_s20 = int_to_ptr.vmem [resolvable:$true] %s386_s20 }
  0x39   :  { %444 = vmatpush3.bf16.msra.mxu0 %v503_v1  ;;  %456 = vmatpush3.bf16.msra.mxu1 %v507_v3  ;;  %v510_v9 = vld [vmem:[#allocation5 + $0x18] sm:$0xff]   ;;  %v511_v10 = vld [vmem:[#allocation5 + $0x20] sm:$0xff]   ;;  %v512_v11 = vld [vmem:[#allocation5 + $0x28] sm:$0xff]   ;;  %p594_p11 = scmp.lt.s32.totalorder %s387_s20, %s387_s20 }
  0x3a   :  { %445 = vmatprep.subr.bf16.mxu0 %v622_v0  ;;  %457 = vmatprep.subr.bf16.mxu1 %v622_v0  ;;  %v513_v12 = vld [vmem:[#allocation5 + $0x30] sm:$0xff]   ;;  %v514_v13 = vld [vmem:[#allocation5 + $0x38] sm:$0xff]   ;;  %v515_v14 = vld [vmem:[#allocation7] sm:$0xff]  }
  0x3b   :  { %v516_v15 = vld [vmem:[#allocation7 + $0x8] sm:$0xff]   ;;  %v517_v16 = vld [vmem:[#allocation7 + $0x10] sm:$0xff]   ;;  %v518_v17 = vld [vmem:[#allocation7 + $0x18] sm:$0xff]  }
  0x3c   :  { %v519_v18 = vld [vmem:[#allocation7 + $0x20] sm:$0xff]   ;;  %v520_v19 = vld [vmem:[#allocation7 + $0x28] sm:$0xff]   ;;  %v521_v28 = vld [vmem:[#allocation7 + $0x30] sm:$0xff]  }
  0x3d   :  { %446 = vmatpush3.bf16.msra.mxu0 %v504_v2  ;;  %458 = vmatpush3.bf16.msra.mxu1 %v508_v5  ;;  %v396_v20 = vld [vmem:[%s769_s2] ss:$0 sm:$0xff]  ;;  %v522_v29 = vld [vmem:[#allocation7 + $0x38] sm:$0xff]  }
  0x3e   :  { %447 = vmatprep.subr.bf16.mxu0 %v622_v0  ;;  %459 = vmatprep.subr.bf16.mxu1 %v622_v0  ;;  %v402_v30 = vld [vmem:[%s771_s4] ss:$0 sm:$0xff]  ;;  %s589_s4 = scalar_lea.vmem %s387_s20, 32 }
  0x3f   :  { %v411_v38 = vld [vmem:[%s773_s6] ss:$0 sm:$0xff]  ;;  %p590_p10 = scmp.ne.s32.totalorder %s387_s20, %s589_s4  ;;  %p595_p12 = scmp.lt.s32.totalorder %s589_s4, %s589_s4 }
  0x41   :  { %448 = vmatpush3.bf16.msra.mxu0 %v505_v4  ;;  %460 = vmatpush3.bf16.msra.mxu1 %v509_v7  ;;  %p596_p13 = por %p595_p12, %p594_p11 }
  0x42   :  { %449 = vmatprep.subr.bf16.mxu0 %v622_v0  ;;  %461 = vmatprep.subr.bf16.mxu1 %v622_v0 }
  0x43   :  { %p597_p0 = pnand %p596_p13, %p590_p10 }
  0x45   :  { %450 = vmatpush3.bf16.msra.mxu0 %v506_v6  ;;  %462 = vmatpush3.bf16.msra.mxu1 %v510_v9 }
  0x46   :  { %475 = vmatprep.subr.bf16.mxu0 %v622_v0  ;;  %463 = vmatprep.subr.bf16.mxu1 %v622_v0 }
  0x48   :  { %452 = vmatmul.mubr.msk.bf16.vlgmr.msra.gmra.mrb[0].mxu0 %vm109_vm1, %v69_v8 }
  0x49   :  { %491 = vmatprep.mubr.msk.bf16.mxu0 %vm623_vm0, %v622_v0  ;;  %464 = vmatpush3.bf16.msra.mxu1 %v511_v10 }
  0x4a   :  { %465 = vmatprep.subr.bf16.mxu1 %v622_v0  ;;  %476 = vmatpush3.bf16.msra.mxu0 %v515_v14 }
  0x4b   :  { %477 = vmatprep.subr.bf16.mxu0 %v622_v0 }
  0x4d   :  { %466 = vmatpush3.bf16.msra.mxu1 %v512_v11 }
  0x4e   :  { %467 = vmatprep.subr.bf16.mxu1 %v622_v0  ;;  %478 = vmatpush3.bf16.msra.mxu0 %v516_v15 }
  0x4f   :  { %479 = vmatprep.subr.bf16.mxu0 %v622_v0 }
  0x51   :  { %468 = vmatpush3.bf16.msra.mxu1 %v513_v12 }
  0x52   :  { %469 = vmatprep.subr.bf16.mxu1 %v622_v0  ;;  %480 = vmatpush3.bf16.msra.mxu0 %v517_v16 }
  0x53   :  { %481 = vmatprep.subr.bf16.mxu0 %v622_v0 }
  0x55   :  { %470 = vmatpush3.bf16.msra.mxu1 %v514_v13 }
  0x56   :  { %482 = vmatpush3.bf16.msra.mxu0 %v518_v17 }
  0x57   :  { %483 = vmatprep.subr.bf16.mxu0 %v622_v0 }
  0x5a   :  { %484 = vmatpush3.bf16.msra.mxu0 %v519_v18 }
  0x5b   :  { %485 = vmatprep.subr.bf16.mxu0 %v622_v0 }
  0x5e   :  { %486 = vmatpush3.bf16.msra.mxu0 %v520_v19 }
  0x5f   :  { %487 = vmatprep.subr.bf16.mxu0 %v622_v0 }
  0x62   :  { %488 = vmatpush3.bf16.msra.mxu0 %v521_v28 }
  0x63   :  { %489 = vmatprep.subr.bf16.mxu0 %v622_v0 }
  0x66   :  { %490 = vmatpush3.bf16.msra.mxu0 %v522_v29 }
 0x11b   :  { %v147_v21 = vpop.f32.mrb[0].mxu0 }
 0x11c   :  { %v148_v22 = vadd.f32 %v396_v20, %v147_v21  ;;  %v453_v23 = vpop.f32.mrb[1].mxu0 }
 0x11d   :  { %v150_v24 = vpop.f32.mrb[2].mxu0 }
 0x11e   :  { %v153_v25 = vmax.f32 %v148_v22, 0.0  ;;  %v454_v26 = vpop.f32.mrb[3].mxu0 }
 0x120   :  { %v154_v27 = vpack.c.bf16 %v153_v25, %v153_v25 }
 0x122   :  { %472 = vmatmul.mubr.bf16.vlgmr.msra.gmra.mrb[0].mxu1 %v154_v27 }
 0x1f5   :  { %v260_v31 = vpop.f32.mrb[0].mxu1 }
 0x1f6   :  { %v261_v32 = vadd.f32 %v402_v30, %v260_v31  ;;  %v473_v33 = vpop.f32.mrb[1].mxu1 }
 0x1f7   :  { %v263_v34 = vpop.f32.mrb[2].mxu1 }
 0x1f8   :  { %v266_v35 = vmax.f32 %v261_v32, 0.0  ;;  %v474_v36 = vpop.f32.mrb[3].mxu1 }
 0x1fa   :  { %v267_v37 = vpack.c.bf16 %v266_v35, %v266_v35 }
 0x1fc   :  { %492 = vmatmul.mubr.bf16.vlgmr.msra.gmra.mrb[4].mxu0 %v267_v37 }
 0x2cf   :  { %v373_v39 = vpop.f32.mrb[4].mxu0 }
 0x2d0   :  { %v374_v40 = vadd.f32 %v411_v38, %v373_v39  ;;  %v493_v41 = vpop.f32.mrb[5].mxu0 }
 0x2d1   :  { %v376_v42 = vpop.f32.mrb[6].mxu0 }
 0x2d2   :  { %379 = vst [vmem:[#allocation8] sm:$0x3] %v374_v40  ;;  %v494_v43 = vpop.f32.mrb[7].mxu0 }
 0x2d3   :  { %600 = shalt.err (!%p597_p0)
}
 0x2d4   :  { %s601_s6 = scalar_lea.hbm %s774_s7, 32 }
 0x2d5   :  { %p602_p1 = scmp.ne.s32.totalorder %s774_s7, %s601_s6  ;;  %p605_p2 = scmp.lt.u32.totalorder %s601_s6, %s774_s7 }
 0x2d7   :  { %p607_p3 = pnand %p605_p2, %p602_p1 }
 0x2d9   :  { %610 = shalt.err (!%p607_p3)
}
 0x2da   :  { %389 = dma.vmem_to_hbm [thread:$0]  %s387_s20, 32, %s774_s7, [#allocation4]  }
 0x2db   :  { %615 = dma.done.wait [#allocation4], 32  }
 0x2dc   :  { %616 = vsyncadd [#allocation4], 4294967264 }
 0x2dd   :  { %393 = vsyncpa [#allocation3], 1 }
 0x2de   :  { %394 = vsyncpa [#allocation6], 1 }
 0x2df   :  { %395 = vsyncpa [#allocation4], 1 }

</bundles_post_ra>
